<compile_context>
chip_gen: v5e
topology: v5e:2x2
jax: 0.10.0
libtpu: 0.0.40
codegen_flags: <defaults>
</compile_context>

<pallas_src>
import functools

import jax
import jax.numpy as jnp
from jax.experimental import pallas as pl
from jax.experimental.pallas import tpu as pltpu

LANE = 128
DEFAULT_BLOCK_ROWS = 4096   # (4096, 128) f32 tile per input per grid step
MAX_PARALLEL_CHUNKS = 8     # outer "parallel" grid axis (megacore on v7x)
VMEM_LIMIT_BYTES = 32 * 1024 * 1024


def _mse_variance_kernel(x_ref, v_ref, t_ref, out_ref, *,
                         n_rows, block_rows, inner_steps, need_mask):
    p = pl.program_id(0)   # parallel chunk
    i = pl.program_id(1)   # sequential step within chunk

    @pl.when(i == 0)
    def _init():
        out_ref[...] = jnp.zeros_like(out_ref)

    x = x_ref[...].astype(jnp.float32)
    v = v_ref[...].astype(jnp.float32)
    t = t_ref[...].astype(jnp.float32)

    diff = x - t
    # diff^2 / (2*exp(v)) + v/2  ==  0.5*diff^2*exp(-v) + 0.5*v   (one EUP op)
    term = 0.5 * (diff * diff) * jnp.exp(-v) + 0.5 * v

    if need_mask:
        # Zero out rows past the real data (ragged final block and/or
        # clamped duplicate blocks from the chunk decomposition).
        blk = p * inner_steps + i
        row0 = blk * block_rows
        rows = row0 + jax.lax.broadcasted_iota(jnp.int32, (block_rows, LANE), 0)
        term = jnp.where(rows < n_rows, term, 0.0)

    # Fold the (block_rows, 128) tile into a vreg-shaped (8, 128) partial sum.
    # The reshape splits the sublane-major axis, so it is layout-preserving and
    # the reduction is pure vreg-wise VPU adds; the full cross-lane reduction
    # happens once on (num_chunks, 8, 128) in the wrapper.
    partial = term.reshape(block_rows // 8, 8, LANE).sum(axis=0)
    out_ref[...] += partial[None, :, :]


def mse_variance_loss(inp, variance, target):
    """Pallas implementation of MSEVarianceLoss.forward; returns a scalar f32."""
    assert inp.shape == variance.shape == target.shape
    n_elems = inp.size

    def flat(a):
        a = a.reshape(-1)
        pad = (-a.shape[0]) % LANE
        if pad:
            # At most 127 zero elements; a zero contributes exactly 0 to the
            # sum (diff=0, 0.5*v=0), so no extra mask is required for them.
            a = jnp.pad(a, (0, pad))
        return a.reshape(-1, LANE)

    x2d, v2d, t2d = flat(inp), flat(variance), flat(target)
    n_rows = x2d.shape[0]

    block_rows = min(DEFAULT_BLOCK_ROWS, pl.cdiv(n_rows, 8) * 8)
    total_blocks = pl.cdiv(n_rows, block_rows)
    num_chunks = min(total_blocks, MAX_PARALLEL_CHUNKS)
    inner_steps = pl.cdiv(total_blocks, num_chunks)
    num_chunks = pl.cdiv(total_blocks, inner_steps)   # trim wasted grid slots

    # Mask needed iff the (chunks x steps x block_rows) cover exceeds n_rows
    # (ragged last block and/or clamped duplicate grid slots).
    need_mask = (num_chunks * inner_steps * block_rows) != n_rows

    def in_map(p, i):
        # Clamp so out-of-range grid slots re-read a valid block (fully masked).
        return (jnp.minimum(p * inner_steps + i, total_blocks - 1), 0)

    in_spec = pl.BlockSpec((block_rows, LANE), in_map)

    partials = pl.pallas_call(
        functools.partial(
            _mse_variance_kernel,
            n_rows=n_rows,
            block_rows=block_rows,
            inner_steps=inner_steps,
            need_mask=need_mask),
        out_shape=jax.ShapeDtypeStruct((num_chunks, 8, LANE), jnp.float32),
        grid_spec=pltpu.PrefetchScalarGridSpec(
            num_scalar_prefetch=0,
            grid=(num_chunks, inner_steps),
            in_specs=[in_spec, in_spec, in_spec],
            out_specs=pl.BlockSpec((1, 8, LANE), lambda p, i: (p, 0, 0)),
        ),
        compiler_params=pltpu.CompilerParams(
            dimension_semantics=("parallel", "arbitrary"),
            vmem_limit_bytes=VMEM_LIMIT_BYTES),
    )(x2d, v2d, t2d)

    return jnp.sum(partials) / jnp.float32(n_elems)


def _reference(inp, variance, target):
    return jnp.mean(
        (inp - target) ** 2 / (2.0 * jnp.exp(variance)) + 0.5 * variance
    )


if __name__ == "__main__":
    key = jax.random.PRNGKey(0)
    k1, k2, k3 = jax.random.split(key, 3)

    # Small NCHW-like shapes consistent with an image-regression head.
    shape = (2, 4, 16, 16)
    x = jax.random.normal(k1, shape, dtype=jnp.float32)
    var = 0.5 * jax.random.normal(k2, shape, dtype=jnp.float32)
    tgt = jax.random.normal(k3, shape, dtype=jnp.float32)

    loss = jax.block_until_ready(mse_variance_loss(x, var, tgt))
    ref = jax.block_until_ready(_reference(x, var, tgt))

    assert jnp.allclose(loss, ref, rtol=1e-5, atol=1e-6), (loss, ref)
    print("KERNEL_OK")
</pallas_src>

<mosaic_0001>
module attributes {stable_mosaic.version = 11 : i64} {
  func.func @_mse_variance_kernel(%arg0: i32, %arg1: i32, %arg2: memref<16x128xf32, #tpu.memory_space<vmem>>, %arg3: memref<16x128xf32, #tpu.memory_space<vmem>>, %arg4: memref<16x128xf32, #tpu.memory_space<vmem>>, %arg5: memref<1x8x128xf32, #tpu.memory_space<vmem>>) attributes {dimension_semantics = [#tpu.dimension_semantics<parallel>, #tpu.dimension_semantics<arbitrary>], iteration_bounds = array<i64: 1, 1>, scalar_prefetch = 0 : i64, scratch_operands = 0 : i64, tpu.core_type = #tpu.core_type<tc>, window_params = [{transform_indices = @transform_0, window_bounds = array<i64: 16, 128>}, {transform_indices = @transform_1, window_bounds = array<i64: 16, 128>}, {transform_indices = @transform_2, window_bounds = array<i64: 16, 128>}, {transform_indices = @transform_3, window_bounds = array<i64: 1, 8, 128>}]} {
    %c0_i32 = arith.constant 0 : i32
    %0 = arith.cmpi eq, %arg1, %c0_i32 : i32
    %1 = arith.extui %0 : i1 to i32
    %c0_i32_0 = arith.constant 0 : i32
    %2 = arith.cmpi ne, %1, %c0_i32_0 : i32
    scf.if %2 {
      %cst_15 = arith.constant 0.000000e+00 : f32
      %23 = vector.broadcast %cst_15 : f32 to vector<1x8x128xf32>
      %c0_16 = arith.constant 0 : index
      %c0_17 = arith.constant 0 : index
      %c0_18 = arith.constant 0 : index
      %24 = vector.load %arg5[%c0_16, %c0_17, %c0_18] : memref<1x8x128xf32, #tpu.memory_space<vmem>>, vector<1x8x128xf32>
      tpu.vector_store %arg5[%c0_16, %c0_17, %c0_18], %23 {strides = array<i32>} : memref<1x8x128xf32, #tpu.memory_space<vmem>>, vector<1x8x128xf32>,
    } else {
    }
    %c0 = arith.constant 0 : index
    %c0_1 = arith.constant 0 : index
    %3 = vector.load %arg2[%c0, %c0_1] : memref<16x128xf32, #tpu.memory_space<vmem>>, vector<16x128xf32>
    %c0_2 = arith.constant 0 : index
    %c0_3 = arith.constant 0 : index
    %4 = vector.load %arg3[%c0_2, %c0_3] : memref<16x128xf32, #tpu.memory_space<vmem>>, vector<16x128xf32>
    %c0_4 = arith.constant 0 : index
    %c0_5 = arith.constant 0 : index
    %5 = vector.load %arg4[%c0_4, %c0_5] : memref<16x128xf32, #tpu.memory_space<vmem>>, vector<16x128xf32>
    %6 = arith.subf %3, %5 : vector<16x128xf32>
    %7 = arith.mulf %6, %6 : vector<16x128xf32>
    %cst = arith.constant 5.000000e-01 : f32
    %8 = vector.broadcast %cst : f32 to vector<16x128xf32>
    %9 = arith.mulf %8, %7 : vector<16x128xf32>
    %cst_6 = arith.constant 0.000000e+00 : f32
    %10 = vector.broadcast %cst_6 : f32 to vector<16x128xf32>
    %11 = arith.subf %10, %4 : vector<16x128xf32>
    %12 = math.exp %11 : vector<16x128xf32>
    %13 = arith.mulf %9, %12 : vector<16x128xf32>
    %cst_7 = arith.constant 5.000000e-01 : f32
    %14 = vector.broadcast %cst_7 : f32 to vector<16x128xf32>
    %15 = arith.mulf %14, %4 : vector<16x128xf32>
    %16 = arith.addf %13, %15 : vector<16x128xf32>
    %17 = vector.shape_cast %16 : vector<16x128xf32> to vector<2x8x128xf32>
    %cst_8 = arith.constant dense<0.000000e+00> : vector<8x128xf32>
    %18 = vector.multi_reduction <add>, %17, %cst_8 [0] : vector<2x8x128xf32> to vector<8x128xf32>
    %c0_9 = arith.constant 0 : index
    %c0_10 = arith.constant 0 : index
    %c0_11 = arith.constant 0 : index
    %19 = vector.load %arg5[%c0_9, %c0_10, %c0_11] : memref<1x8x128xf32, #tpu.memory_space<vmem>>, vector<1x8x128xf32>
    %20 = vector.shape_cast %18 : vector<8x128xf32> to vector<1x8x128xf32>
    %21 = arith.addf %19, %20 : vector<1x8x128xf32>
    %c0_12 = arith.constant 0 : index
    %c0_13 = arith.constant 0 : index
    %c0_14 = arith.constant 0 : index
    %22 = vector.load %arg5[%c0_12, %c0_13, %c0_14] : memref<1x8x128xf32, #tpu.memory_space<vmem>>, vector<1x8x128xf32>
    tpu.vector_store %arg5[%c0_12, %c0_13, %c0_14], %21 {strides = array<i32>} : memref<1x8x128xf32, #tpu.memory_space<vmem>>, vector<1x8x128xf32>,
    return
  }
  func.func @transform_0(%arg0: i32, %arg1: i32) -> (i32, i32) {
    %c1_i32 = arith.constant 1 : i32
    %0 = arith.muli %arg0, %c1_i32 : i32
    %1 = arith.addi %0, %arg1 : i32
    %c0_i32 = arith.constant 0 : i32
    %2 = arith.minsi %1, %c0_i32 : i32
    %c0_i32_0 = arith.constant 0 : i32
    %c0_i32_1 = arith.constant 0 : i32
    return %2, %c0_i32_0 : i32, i32
  }
  func.func @transform_1(%arg0: i32, %arg1: i32) -> (i32, i32) {
    %c1_i32 = arith.constant 1 : i32
    %0 = arith.muli %arg0, %c1_i32 : i32
    %1 = arith.addi %0, %arg1 : i32
    %c0_i32 = arith.constant 0 : i32
    %2 = arith.minsi %1, %c0_i32 : i32
    %c0_i32_0 = arith.constant 0 : i32
    %c0_i32_1 = arith.constant 0 : i32
    return %2, %c0_i32_0 : i32, i32
  }
  func.func @transform_2(%arg0: i32, %arg1: i32) -> (i32, i32) {
    %c1_i32 = arith.constant 1 : i32
    %0 = arith.muli %arg0, %c1_i32 : i32
    %1 = arith.addi %0, %arg1 : i32
    %c0_i32 = arith.constant 0 : i32
    %2 = arith.minsi %1, %c0_i32 : i32
    %c0_i32_0 = arith.constant 0 : i32
    %c0_i32_1 = arith.constant 0 : i32
    return %2, %c0_i32_0 : i32, i32
  }
  func.func @transform_3(%arg0: i32, %arg1: i32) -> (i32, i32, i32) {
    %c0_i32 = arith.constant 0 : i32
    %c0_i32_0 = arith.constant 0 : i32
    %c0_i32_1 = arith.constant 0 : i32
    return %arg0, %c0_i32, %c0_i32_0 : i32, i32, i32
  }
}

</mosaic_0001>

<bundles_post_ra>
// kernel: tpu_custom_call.1
= control target key start
LH: loop header
LB: loop body
LE: loop exit
PB: predicated region body
PF: predicated region fallthrough
CT: control target
= control target key end

     0   :  { %8 = vsyncpa [#allocation3], 0  ;;  %s300_s0 = inlined_call_operand.hbm [shape: f32[16,128], index: 0, kind: input, shape index: {}]   ;;  %s301_s1 = inlined_call_operand.hbm [shape: f32[16,128], index: 1, kind: input, shape index: {}]   ;;  %s302_s2 = inlined_call_operand.hbm [shape: f32[16,128], index: 2, kind: input, shape index: {}]   ;;  %s303_s3 = inlined_call_operand.hbm [shape: f32[1,8,128], index: 3, kind: output, shape index: {}]  }
   0x1   :  { %9 = vsyncpa [#allocation6], 0 }
   0x2   :  { %10 = vsyncpa [#allocation4], 0  ;;  %s40_s14 = sshll.u32 %s301_s1, 4  ;;  %s262_s15 = smov [#allocation5]   ;;  %s41_s14 = int_to_ptr.hbm [resolvable:$true] %s40_s14 }
   0x3   :  { %s42_s16 = sshll.u32 %s262_s15, 4  ;;  %s21_s19 = sshll.u32 %s300_s0, 4  ;;  %s43_s16 = int_to_ptr.vmem [resolvable:$true] %s42_s16  ;;  %s22_s19 = int_to_ptr.hbm [resolvable:$true] %s21_s19 }
   0x4   :  { %s263_s20 = smov 128   ;;  %s264_s21 = smov 8  }
   0x5   :  { %48 = dma.hbm_to_vmem [thread:$0]  %s41_s14, 256, %s43_s16, [#allocation6], %s263_s20, %s263_s20, %s264_s21  }
   0x6   :  { %s265_s22 = smov [#allocation2]   ;;  %s59_s26 = sshll.u32 %s302_s2, 4  ;;  %s60_s26 = int_to_ptr.hbm [resolvable:$true] %s59_s26 }
   0x7   :  { %s23_s23 = sshll.u32 %s265_s22, 4  ;;  %s266_s1 = smov [#allocation7]   ;;  %s24_s23 = int_to_ptr.vmem [resolvable:$true] %s23_s23 }
   0x8   :  { %29 = dma.hbm_to_vmem [thread:$0]  %s22_s19, 256, %s24_s23, [#allocation3], %s263_s20, %s263_s20, %s264_s21  }
   0x9   :  { %s61_s27 = sshll.u32 %s266_s1, 4  ;;  %s62_s27 = int_to_ptr.vmem [resolvable:$true] %s61_s27 }
   0xa   :  { %67 = dma.hbm_to_vmem [thread:$0]  %s60_s26, 256, %s62_s27, [#allocation6], %s263_s20, %s263_s20, %s264_s21  }
   0xb   :  { %256 = dma.done.wait [#allocation3], 256  }
   0xc   :  { %257 = vsyncadd [#allocation3], 4294967040 }
   0xd   :  { %258 = dma.done.wait [#allocation6], 512  }
   0xe   :  { %259 = vsyncadd [#allocation6], 4294966784  ;;  %v97_v0 = vld [vmem:[#allocation2] sm:$0xff]  ;;  %v98_v1 = vld [vmem:[#allocation2 + $0x8] sm:$0xff]  ;;  %s267_s0 = smov [#allocation8]   ;;  %s132_s30 = sshll.u32 %s303_s3, 4  ;;  %s133_s30 = int_to_ptr.hbm [resolvable:$true] %s132_s30 }
   0xf   :  { %v99_v2 = vld [vmem:[#allocation5] sm:$0xff]  ;;  %v100_v3 = vld [vmem:[#allocation5 + $0x8] sm:$0xff]  ;;  %v101_v4 = vld [vmem:[#allocation7] sm:$0xff]  ;;  %s130_s2 = sshll.u32 %s267_s0, 4  ;;  %s131_s2 = int_to_ptr.vmem [resolvable:$true] %s130_s2 }
  0x10   :  { %v102_v5 = vld [vmem:[#allocation7 + $0x8] sm:$0xff]  ;;  %v109_v6 = vsub.f32 0.0, %v99_v2  ;;  %v103_v7 = vsub.f32 %v97_v0, %v101_v4  ;;  %v110_v9 = vsub.f32 0.0, %v100_v3  ;;  %v117_v16 = vmul.f32 0.5, %v99_v2 }
  0x11   :  { %v104_v8 = vsub.f32 %v98_v1, %v102_v5  ;;  %v118_v18 = vmul.f32 0.5, %v100_v3 }
  0x12   :  { %v111_v10 = vmul.f32 1.442695, %v109_v6  ;;  %v105_v11 = vmul.f32 %v103_v7, %v103_v7  ;;  %v113_v12 = vmul.f32 1.442695, %v110_v9 }
  0x13   :  { %v106_v13 = vmul.f32 %v104_v8, %v104_v8 }
  0x14   :  { %156 = vpow2.f32 %v111_v10  ;;  %v107_v14 = vmul.f32 0.5, %v105_v11 }
  0x15   :  { %158 = vpow2.f32 %v113_v12  ;;  %v108_v15 = vmul.f32 0.5, %v106_v13 }
  0x1a   :  { %v157_v17 = vpop.eup %156 }
  0x1b   :  { %v159_v19 = vpop.eup %158  ;;  %v115_v20 = vmul.f32 %v157_v17, %v107_v14 }
  0x1c   :  { %v116_v21 = vmul.f32 %v159_v19, %v108_v15 }
  0x1d   :  { %v119_v22 = vadd.f32 %v117_v16, %v115_v20 }
  0x1e   :  { %v120_v23 = vadd.f32 %v118_v18, %v116_v21 }
  0x20   :  { %v121_v24 = vadd.f32 %v120_v23, %v119_v22 }
  0x22   :  { %124 = vst [vmem:[#allocation8] sm:$0xff] %v121_v24 }
  0x23   :  { %135 = dma.vmem_to_hbm [thread:$0]  %s131_s2, 128, %s133_s30, [#allocation4]  }
  0x24   :  { %260 = dma.done.wait [#allocation4], 128  }
  0x25   :  { %261 = vsyncadd [#allocation4], 4294967168 }
  0x26   :  { %140 = vsyncpa [#allocation3], 1 }
  0x27   :  { %141 = vsyncpa [#allocation6], 1 }
  0x28   :  { %142 = vsyncpa [#allocation4], 1 }

</bundles_post_ra>
